<compile_context>
chip_gen: v5e
topology: v5e:2x2
jax: 0.10.0
libtpu: 0.0.40
codegen_flags: <defaults>
</compile_context>

<pallas_src>
import jax
import jax.numpy as jnp
from jax import lax
from jax.experimental import pallas as pl
from jax.experimental.pallas import tpu as pltpu


_VMEM_BUDGET_BYTES = 40 * 1024 * 1024   # footprint target: fits v7x's 64 MiB VMEM with headroom
_VMEM_LIMIT_BYTES = 48 * 1024 * 1024    # explicit scoped-VMEM limit (valid on v5e/v6e/v7x)
_MAX_TILE_B = 4096


def _round_up(x, m):
    return (x + m - 1) // m * m


def _choose_tile_b(B, D):
    """Pick the batch tile: as large as the VMEM budget allows, a multiple of
    128 (lane-dense output blocks), and >= 2 grid steps when B is big enough
    (v7x has two TensorCores sharing the 'parallel' batch axis)."""
    # Resident weights/biases (double-buffered by the default pipeliner).
    resident = 2 * (D * 256 * 2 + 256 * 128 * 2 + (256 + 128 + 128) * 4)
    # Per-batch-row VMEM cost: 2x double-buffered f32 x rows, h1 (f32 epilogue
    # + bf16 temp), h2 (f32), double-buffered f32 output lane.
    per_row = 2 * D * 4 + 256 * (4 + 2) + 128 * 4 + 2 * 4
    avail = max(_VMEM_BUDGET_BYTES - resident, 1 << 20)
    tile = min(_MAX_TILE_B, avail // per_row)
    tile = max(128, (tile // 128) * 128)
    b_al = _round_up(B, 128)
    if b_al >= 256:
        # Keep at least 2 grid steps so both v7x TensorCores are engaged.
        half = _round_up((b_al + 1) // 2, 128)
        tile = min(tile, half)
    return min(tile, b_al)


def _value_kernel(x_ref, w1_ref, b1_ref, w2_ref, b2_ref, w3_ref, b3_ref, o_ref):
    # x_ref:  [TILE_B, D]  f32  (cast to bf16 in-kernel, under MXU/DMA slack)
    # w1_ref: [D, 256] bf16, b1_ref: [1, 256] f32
    # w2_ref: [256, 128] bf16, b2_ref: [1, 128] f32
    # w3_ref: [1, 128] f32 (fc3 weight as a row), b3_ref: [1, 1] f32 in SMEM
    # o_ref:  [1, TILE_B] f32 (lane-dense value row)
    x = x_ref[...].astype(jnp.bfloat16)

    # fc1 + ReLU: bf16 MXU matmul, f32 accumulate, f32 epilogue, bf16 temporary.
    h1 = jnp.dot(x, w1_ref[...], preferred_element_type=jnp.float32)
    h1 = jnp.maximum(h1 + b1_ref[...], 0.0).astype(jnp.bfloat16)

    # fc2 + ReLU (epilogue and h2 stay f32 for the final head).
    h2 = jnp.dot(h1, w2_ref[...], preferred_element_type=jnp.float32)
    h2 = jnp.maximum(h2 + b2_ref[...], 0.0)

    # fc3 (N=1): contract the 128-dim on the otherwise-idle MXU to get a
    # lane-dense [1, TILE_B] row (full 128-lane stores, no cross-lane reduce).
    val = lax.dot_general(
        w3_ref[...], h2,
        dimension_numbers=(((1,), (1,)), ((), ())),
        preferred_element_type=jnp.float32)
    o_ref[...] = (val + b3_ref[0, 0]).astype(o_ref.dtype)


def value_network_forward(core_output, params):
    """core_output: [batch, 1, core_output_size] f32 -> [batch, 1, 1] f32."""
    w1, b1, w2, b2, w3, b3 = params
    B, S, D = core_output.shape
    assert S == 1, "ValueNetwork expects a singleton middle axis"
    x2d = core_output.reshape(B, D)       # free reshape: no pad, no dtype copy

    tile_b = _choose_tile_b(B, D)
    b_pad = _round_up(B, tile_b)          # output is padded; x stays unpadded (ragged last block)
    grid = (b_pad // tile_b,)

    # Weights in bf16 for the MXU, biases in f32; fc3 weight as a [1, 128] row,
    # fc3 bias as a scalar in SMEM.
    w1_bf = w1.astype(jnp.bfloat16)
    w2_bf = w2.astype(jnp.bfloat16)
    b1_f = b1.reshape(1, 256).astype(jnp.float32)
    b2_f = b2.reshape(1, 128).astype(jnp.float32)
    w3_row = w3.reshape(1, 128).astype(jnp.float32)
    b3_sc = b3.reshape(1, 1).astype(jnp.float32)

    out = pl.pallas_call(
        _value_kernel,
        out_shape=jax.ShapeDtypeStruct((1, b_pad), jnp.float32),
        grid=grid,
        in_specs=[
            pl.BlockSpec((tile_b, D), lambda i: (i, 0)),        # x: moves per step (ragged tail OK)
            pl.BlockSpec((D, 256), lambda i: (0, 0)),           # w1: VMEM-resident
            pl.BlockSpec((1, 256), lambda i: (0, 0)),           # b1: resident
            pl.BlockSpec((256, 128), lambda i: (0, 0)),         # w2: resident
            pl.BlockSpec((1, 128), lambda i: (0, 0)),           # b2: resident
            pl.BlockSpec((1, 128), lambda i: (0, 0)),           # w3 row: resident
            pl.BlockSpec(memory_space=pltpu.MemorySpace.SMEM),  # b3 scalar
        ],
        out_specs=pl.BlockSpec((1, tile_b), lambda i: (0, i)),  # lane-dense value row
        compiler_params=pltpu.CompilerParams(
            dimension_semantics=("parallel",),
            vmem_limit_bytes=_VMEM_LIMIT_BYTES),
    )(x2d, w1_bf, b1_f, w2_bf, b2_f, w3_row, b3_sc)

    return out[0, :B].reshape(B, 1, 1)


def init_params(key, core_output_size):
    """Deterministic init mirroring nn.Linear (uniform +-1/sqrt(fan_in)).

    Weights are stored already transposed to [in, out]; biases as [1, out].
    """
    dims = [(core_output_size, 256), (256, 128), (128, 1)]
    params = []
    for (fan_in, fan_out) in dims:
        key, kw, kb = jax.random.split(key, 3)
        bound = 1.0 / jnp.sqrt(jnp.float32(fan_in))
        w = jax.random.uniform(kw, (fan_in, fan_out), jnp.float32, -bound, bound)
        b = jax.random.uniform(kb, (1, fan_out), jnp.float32, -bound, bound)
        params.extend([w, b])
    return tuple(params)


if __name__ == "__main__":
    batch = 2
    core_output_size = 128   # lane-aligned D (pad upstream in real use if not a multiple of 128)

    key = jax.random.PRNGKey(0)
    key, kx = jax.random.split(key)
    core_output = jax.random.normal(kx, (batch, 1, core_output_size), jnp.float32)

    params = init_params(key, core_output_size)

    value = value_network_forward(core_output, params)
    value = jax.block_until_ready(value)
    assert value.shape == (batch, 1, 1), value.shape

    # Reference that mirrors the kernel's bf16-matmul / f32-accumulate math.
    w1, b1, w2, b2, w3, b3 = params
    x = core_output.reshape(batch, core_output_size)
    h1 = jnp.dot(x.astype(jnp.bfloat16), w1.astype(jnp.bfloat16),
                 preferred_element_type=jnp.float32) + b1
    h1 = jnp.maximum(h1, 0.0).astype(jnp.bfloat16)
    h2 = jnp.dot(h1, w2.astype(jnp.bfloat16),
                 preferred_element_type=jnp.float32) + b2
    h2 = jnp.maximum(h2, 0.0)
    ref_bf = (h2 @ w3 + b3).reshape(batch, 1, 1)
    assert jnp.allclose(value, ref_bf, atol=2e-3, rtol=2e-3), (value, ref_bf)

    # Loose check against full-f32 PyTorch-equivalent math.
    ref_f32 = jnp.maximum(x @ w1 + b1, 0.0)
    ref_f32 = jnp.maximum(ref_f32 @ w2 + b2, 0.0)
    ref_f32 = (ref_f32 @ w3 + b3).reshape(batch, 1, 1)
    assert jnp.allclose(value, ref_f32, atol=5e-2, rtol=5e-2), (value, ref_f32)

    print("KERNEL_OK")
</pallas_src>

<mosaic_0001>
module attributes {stable_mosaic.version = 11 : i64} {
  func.func @_value_kernel(%arg0: i32, %arg1: memref<128x128xf32, #tpu.memory_space<vmem>>, %arg2: memref<128x256xbf16, #tpu.memory_space<vmem>>, %arg3: memref<1x256xf32, #tpu.memory_space<vmem>>, %arg4: memref<256x128xbf16, #tpu.memory_space<vmem>>, %arg5: memref<1x128xf32, #tpu.memory_space<vmem>>, %arg6: memref<1x128xf32, #tpu.memory_space<vmem>>, %arg7: memref<1x1xf32, #tpu.memory_space<smem>>, %arg8: memref<1x128xf32, #tpu.memory_space<vmem>>) attributes {dimension_semantics = [#tpu.dimension_semantics<parallel>], iteration_bounds = array<i64: 1>, scalar_prefetch = 0 : i64, scratch_operands = 0 : i64, tpu.core_type = #tpu.core_type<tc>, window_params = [{transform_indices = @transform_0, window_bounds = array<i64: 128, 128>}, {pipeline_mode = #tpu.pipeline_mode<synchronous>, transform_indices = @transform_1, window_bounds = array<i64: 128, 256>}, {pipeline_mode = #tpu.pipeline_mode<synchronous>, transform_indices = @transform_2, window_bounds = array<i64: 1, 256>}, {pipeline_mode = #tpu.pipeline_mode<synchronous>, transform_indices = @transform_3, window_bounds = array<i64: 256, 128>}, {pipeline_mode = #tpu.pipeline_mode<synchronous>, transform_indices = @transform_4, window_bounds = array<i64: 1, 128>}, {pipeline_mode = #tpu.pipeline_mode<synchronous>, transform_indices = @transform_5, window_bounds = array<i64: 1, 128>}, {transform_indices = @transform_6, window_bounds = array<i64: 1, 1>}, {transform_indices = @transform_7, window_bounds = array<i64: 1, 128>}]} {
    %c0 = arith.constant 0 : index
    %c0_0 = arith.constant 0 : index
    %0 = vector.load %arg1[%c0, %c0_0] : memref<128x128xf32, #tpu.memory_space<vmem>>, vector<128x128xf32>
    %1 = arith.truncf %0 : vector<128x128xf32> to vector<128x128xbf16>
    %c0_1 = arith.constant 0 : index
    %c0_2 = arith.constant 0 : index
    %2 = vector.load %arg2[%c0_1, %c0_2] : memref<128x256xbf16, #tpu.memory_space<vmem>>, vector<128x256xbf16>
    %cst = arith.constant dense<0.000000e+00> : vector<128x256xf32>
    %3 = tpu.matmul %1, %2, %cst {dimension_numbers = #tpu.dot_dimension_numbers<[1], [0], [0], [1], [0, 0, 1, 1], [], []>} : vector<128x128xbf16>, vector<128x256xbf16>, vector<128x256xf32> -> vector<128x256xf32>
    %c0_3 = arith.constant 0 : index
    %c0_4 = arith.constant 0 : index
    %4 = vector.load %arg3[%c0_3, %c0_4] : memref<1x256xf32, #tpu.memory_space<vmem>>, vector<1x256xf32>
    %5 = vector.broadcast %4 : vector<1x256xf32> to vector<128x256xf32>
    %6 = arith.addf %3, %5 : vector<128x256xf32>
    %cst_5 = arith.constant 0.000000e+00 : f32
    %7 = vector.broadcast %cst_5 : f32 to vector<128x256xf32>
    %8 = arith.maximumf %6, %7 : vector<128x256xf32>
    %9 = arith.truncf %8 : vector<128x256xf32> to vector<128x256xbf16>
    %c0_6 = arith.constant 0 : index
    %c0_7 = arith.constant 0 : index
    %10 = vector.load %arg4[%c0_6, %c0_7] : memref<256x128xbf16, #tpu.memory_space<vmem>>, vector<256x128xbf16>
    %cst_8 = arith.constant dense<0.000000e+00> : vector<128x128xf32>
    %11 = tpu.matmul %9, %10, %cst_8 {dimension_numbers = #tpu.dot_dimension_numbers<[1], [0], [0], [1], [0, 0, 1, 1], [], []>} : vector<128x256xbf16>, vector<256x128xbf16>, vector<128x128xf32> -> vector<128x128xf32>
    %c0_9 = arith.constant 0 : index
    %c0_10 = arith.constant 0 : index
    %12 = vector.load %arg5[%c0_9, %c0_10] : memref<1x128xf32, #tpu.memory_space<vmem>>, vector<1x128xf32>
    %13 = vector.broadcast %12 : vector<1x128xf32> to vector<128x128xf32>
    %14 = arith.addf %11, %13 : vector<128x128xf32>
    %cst_11 = arith.constant 0.000000e+00 : f32
    %15 = vector.broadcast %cst_11 : f32 to vector<128x128xf32>
    %16 = arith.maximumf %14, %15 : vector<128x128xf32>
    %c0_12 = arith.constant 0 : index
    %c0_13 = arith.constant 0 : index
    %17 = vector.load %arg6[%c0_12, %c0_13] : memref<1x128xf32, #tpu.memory_space<vmem>>, vector<1x128xf32>
    %cst_14 = arith.constant dense<0.000000e+00> : vector<1x128xf32>
    %18 = tpu.matmul %17, %16, %cst_14 {dimension_numbers = #tpu.dot_dimension_numbers<[1], [1], [0], [0], [0, 0, 1, 0], [], []>} : vector<1x128xf32>, vector<128x128xf32>, vector<1x128xf32> -> vector<1x128xf32>
    %c0_15 = arith.constant 0 : index
    %c0_16 = arith.constant 0 : index
    %19 = memref.load %arg7[%c0_15, %c0_16] : memref<1x1xf32, #tpu.memory_space<smem>>
    %20 = vector.broadcast %19 : f32 to vector<1x128xf32>
    %21 = arith.addf %18, %20 : vector<1x128xf32>
    %c0_17 = arith.constant 0 : index
    %c0_18 = arith.constant 0 : index
    %22 = vector.load %arg8[%c0_17, %c0_18] : memref<1x128xf32, #tpu.memory_space<vmem>>, vector<1x128xf32>
    tpu.vector_store %arg8[%c0_17, %c0_18], %21 {strides = array<i32>} : memref<1x128xf32, #tpu.memory_space<vmem>>, vector<1x128xf32>,
    return
  }
  func.func @transform_0(%arg0: i32) -> (i32, i32) {
    %c0_i32 = arith.constant 0 : i32
    %c0_i32_0 = arith.constant 0 : i32
    return %arg0, %c0_i32 : i32, i32
  }
  func.func @transform_1(%arg0: i32) -> (i32, i32) {
    %c0_i32 = arith.constant 0 : i32
    %c0_i32_0 = arith.constant 0 : i32
    %c0_i32_1 = arith.constant 0 : i32
    return %c0_i32, %c0_i32_0 : i32, i32
  }
  func.func @transform_2(%arg0: i32) -> (i32, i32) {
    %c0_i32 = arith.constant 0 : i32
    %c0_i32_0 = arith.constant 0 : i32
    %c0_i32_1 = arith.constant 0 : i32
    return %c0_i32, %c0_i32_0 : i32, i32
  }
  func.func @transform_3(%arg0: i32) -> (i32, i32) {
    %c0_i32 = arith.constant 0 : i32
    %c0_i32_0 = arith.constant 0 : i32
    %c0_i32_1 = arith.constant 0 : i32
    return %c0_i32, %c0_i32_0 : i32, i32
  }
  func.func @transform_4(%arg0: i32) -> (i32, i32) {
    %c0_i32 = arith.constant 0 : i32
    %c0_i32_0 = arith.constant 0 : i32
    %c0_i32_1 = arith.constant 0 : i32
    return %c0_i32, %c0_i32_0 : i32, i32
  }
  func.func @transform_5(%arg0: i32) -> (i32, i32) {
    %c0_i32 = arith.constant 0 : i32
    %c0_i32_0 = arith.constant 0 : i32
    %c0_i32_1 = arith.constant 0 : i32
    return %c0_i32, %c0_i32_0 : i32, i32
  }
  func.func @transform_6(%arg0: i32) -> (i32, i32) {
    %c0_i32 = arith.constant 0 : i32
    %c0_i32_0 = arith.constant 0 : i32
    %c0_i32_1 = arith.constant 0 : i32
    return %c0_i32, %c0_i32_0 : i32, i32
  }
  func.func @transform_7(%arg0: i32) -> (i32, i32) {
    %c0_i32 = arith.constant 0 : i32
    %c0_i32_0 = arith.constant 0 : i32
    return %c0_i32, %arg0 : i32, i32
  }
}

</mosaic_0001>

<bundles_post_ra>
// kernel: tpu_custom_call.1
= control target key start
LH: loop header
LB: loop body
LE: loop exit
PB: predicated region body
PF: predicated region fallthrough
CT: control target
= control target key end

     0   :  { %13 = vsyncpa [#allocation4], 0  ;;  %s1090_s0 = inlined_call_operand.vmem [shape: f32[2,128], index: 0, kind: input, shape index: {}]   ;;  %s1091_s1 = inlined_call_operand.hbm [shape: bf16[128,256], index: 1, kind: input, shape index: {}]   ;;  %s1092_s2 = inlined_call_operand.hbm [shape: f32[1,256], index: 2, kind: input, shape index: {}]   ;;  %s1093_s3 = inlined_call_operand.hbm [shape: bf16[256,128], index: 3, kind: input, shape index: {}]   ;;  %s1094_s4 = inlined_call_operand.vmem [shape: f32[1,128], index: 4, kind: input, shape index: {}]   ;;  %s1095_s5 = inlined_call_operand.vmem [shape: f32[1,128], index: 5, kind: input, shape index: {}]   ;;  %s1096_s6 = inlined_call_operand.<no memory space> [shape: f32[1,1], index: 6, kind: input, shape index: {}]   ;;  %s1097_s7 = inlined_call_operand.hbm [shape: f32[1,128], index: 7, kind: output, shape index: {}]  }
   0x1   :  { %14 = vsyncpa [#allocation7], 0  ;;  %s36_s26 = sshll.u32 %s1092_s2, 4  ;;  %s37_s26 = int_to_ptr.hbm [resolvable:$true] %s36_s26 }
   0x2   :  { %15 = vsyncpa [#allocation5], 0  ;;  %s904_s27 = smov [#allocation6]   ;;  %s22_s8 = sshll.u32 %s1091_s1, 4  ;;  %s23_s8 = int_to_ptr.hbm [resolvable:$true] %s22_s8 }
   0x3   :  { %s38_s28 = sshll.u32 %s904_s27, 4  ;;  %s905_s9 = smov [#allocation3]   ;;  %s39_s28 = int_to_ptr.vmem [resolvable:$true] %s38_s28 }
   0x4   :  { %41 = dma.hbm_to_vmem [thread:$0]  %s37_s26, 32, %s39_s28, [#allocation7]  }
   0x5   :  { %s24_s10 = sshll.u32 %s905_s9, 4  ;;  %s906_s11 = smov 128   ;;  %s25_s10 = int_to_ptr.vmem [resolvable:$true] %s24_s10 }
   0x6   :  { %s907_s12 = smov 8   ;;  %s46_s2 = sshll.u32 %s1093_s3, 4  ;;  %s47_s2 = int_to_ptr.hbm [resolvable:$true] %s46_s2 }
   0x7   :  { %30 = dma.hbm_to_vmem [thread:$0]  %s23_s8, 2048, %s25_s10, [#allocation4], %s906_s11, %s906_s11, %s907_s12  }
   0x8   :  { %s908_s15 = smov [#allocation8]   ;;  %s909_s17 = smov 64  }
   0x9   :  { %s48_s16 = sshll.u32 %s908_s15, 4  ;;  %s910_s18 = smov 4   ;;  %s49_s16 = int_to_ptr.vmem [resolvable:$true] %s48_s16 }
   0xa   :  { %54 = dma.hbm_to_vmem [thread:$0]  %s47_s2, 2048, %s49_s16, [#allocation7], %s909_s17, %s909_s17, %s910_s18  }
   0xb   :  { %898 = dma.done.wait [#allocation4], 2048  }
   0xc   :  { %899 = vsyncadd [#allocation4], 4294965248 }
   0xd   :  { %900 = dma.done.wait [#allocation7], 2080  }
   0xe   :  { %901 = vsyncadd [#allocation7], 4294965216  ;;  %v691_v0 = vld [vmem:[#allocation3 + $0x70] sm:$0xf]  ;;  %v776_v1 = vld [vmem:[#allocation3 + $0x74] sm:$0xf0] }
   0xf   :  { %v775_v2 = vld [vmem:[#allocation3 + $0x74] sm:$0xf]  ;;  %v692_v3 = vor.u32 %v776_v1, %v691_v0  ;;  %v693_v4 = vld [vmem:[#allocation3 + $0x78] sm:$0xf0]  ;;  %v683_v5 = vld [vmem:[#allocation3 + $0x60] sm:$0xf] }
  0x10   :  { %v774_v6 = vld [vmem:[#allocation3 + $0x64] sm:$0xf0]  ;;  %v696_v7 = vor.u32 %v775_v2, %v693_v4  ;;  %v773_v8 = vld [vmem:[#allocation3 + $0x64] sm:$0xf]  ;;  %v685_v9 = vld [vmem:[#allocation3 + $0x68] sm:$0xf0] }
  0x11   :  { %199 = vmatpush.bf16.msra.mxu0 %v692_v3  ;;  %v684_v10 = vor.u32 %v774_v6, %v683_v5  ;;  %v688_v11 = vor.u32 %v773_v8, %v685_v9  ;;  %v675_v12 = vld [vmem:[#allocation3 + $0x50] sm:$0xf]  ;;  %v772_v13 = vld [vmem:[#allocation3 + $0x54] sm:$0xf0]  ;;  %v771_v14 = vld [vmem:[#allocation3 + $0x54] sm:$0xf] }
  0x12   :  { %248 = vmatpush.bf16.msra.mxu1 %v696_v7  ;;  %v677_v15 = vld [vmem:[#allocation3 + $0x58] sm:$0xf0]  ;;  %v676_v16 = vor.u32 %v772_v13, %v675_v12  ;;  %v667_v18 = vld [vmem:[#allocation3 + $0x40] sm:$0xf]  ;;  %v770_v19 = vld [vmem:[#allocation3 + $0x44] sm:$0xf0] }
  0x13   :  { %v680_v17 = vor.u32 %v771_v14, %v677_v15  ;;  %v769_v20 = vld [vmem:[#allocation3 + $0x44] sm:$0xf]  ;;  %v669_v21 = vld [vmem:[#allocation3 + $0x48] sm:$0xf0]  ;;  %v668_v22 = vor.u32 %v770_v19, %v667_v18  ;;  %v659_v24 = vld [vmem:[#allocation3 + $0x30] sm:$0xf] }
  0x14   :  { %v672_v23 = vor.u32 %v769_v20, %v669_v21  ;;  %v768_v25 = vld [vmem:[#allocation3 + $0x34] sm:$0xf0]  ;;  %v767_v26 = vld [vmem:[#allocation3 + $0x34] sm:$0xf]  ;;  %v661_v27 = vld [vmem:[#allocation3 + $0x38] sm:$0xf0] }
  0x15   :  { %200 = vmatpush.bf16.msra.mxu0 %v684_v10  ;;  %v660_v28 = vor.u32 %v768_v25, %v659_v24  ;;  %v664_v29 = vor.u32 %v767_v26, %v661_v27  ;;  %v651_v30 = vld [vmem:[#allocation3 + $0x20] sm:$0xf]  ;;  %v766_v31 = vld [vmem:[#allocation3 + $0x24] sm:$0xf0]  ;;  %v765_v32 = vld [vmem:[#allocation3 + $0x24] sm:$0xf] }
  0x16   :  { %249 = vmatpush.bf16.msra.mxu1 %v688_v11  ;;  %v653_v33 = vld [vmem:[#allocation3 + $0x28] sm:$0xf0]  ;;  %v652_v34 = vor.u32 %v766_v31, %v651_v30  ;;  %v643_v36 = vld [vmem:[#allocation3 + $0x10] sm:$0xf]  ;;  %v764_v37 = vld [vmem:[#allocation3 + $0x14] sm:$0xf0] }
  0x17   :  { %v656_v35 = vor.u32 %v765_v32, %v653_v33  ;;  %v763_v38 = vld [vmem:[#allocation3 + $0x14] sm:$0xf]  ;;  %v645_v39 = vld [vmem:[#allocation3 + $0x18] sm:$0xf0]  ;;  %v644_v40 = vor.u32 %v764_v37, %v643_v36  ;;  %v635_v42 = vld [vmem:[#allocation3] sm:$0xf] }
  0x18   :  { %v648_v41 = vor.u32 %v763_v38, %v645_v39  ;;  %v762_v43 = vld [vmem:[#allocation3 + $0x4] sm:$0xf0]  ;;  %v761_v44 = vld [vmem:[#allocation3 + $0x4] sm:$0xf]  ;;  %v637_v45 = vld [vmem:[#allocation3 + $0x8] sm:$0xf0] }
  0x19   :  { %201 = vmatpush.bf16.msra.mxu0 %v676_v16  ;;  %v636_v46 = vor.u32 %v762_v43, %v635_v42  ;;  %v73_v47 = vld [vmem:[%s1090_s0] sm:$0xff]  ;;  %v74_v48 = vld [vmem:[%s1090_s0 + $0x8] sm:$0xff]  ;;  %v640_v49 = vor.u32 %v761_v44, %v637_v45  ;;  %v75_v51 = vld [vmem:[%s1090_s0 + $0x10] sm:$0xff]  ;;  %s911_s27 = smov [#allocation9]   ;;  %s622_s8 = sshll.u32 %s1097_s7, 4  ;;  %s623_s8 = int_to_ptr.hbm [resolvable:$true] %s622_s8 }
  0x1a   :  { %250 = vmatpush.bf16.msra.mxu1 %v680_v17  ;;  %v89_v50 = vpack.c.bf16 %v74_v48, %v73_v47  ;;  %v76_v52 = vld [vmem:[%s1090_s0 + $0x18] sm:$0xff]  ;;  %v77_v54 = vld [vmem:[%s1090_s0 + $0x20] sm:$0xff]  ;;  %v78_v55 = vld [vmem:[%s1090_s0 + $0x28] sm:$0xff]  ;;  %s620_s28 = sshll.u32 %s911_s27, 4  ;;  %s621_s28 = int_to_ptr.vmem [resolvable:$true] %s620_s28 }
  0x1b   :  { %v90_v53 = vpack.c.bf16 %v76_v52, %v75_v51  ;;  %v91_v56 = vpack.c.bf16 %v78_v55, %v77_v54  ;;  %v79_v57 = vld [vmem:[%s1090_s0 + $0x30] sm:$0xff]  ;;  %v80_v58 = vld [vmem:[%s1090_s0 + $0x38] sm:$0xff]  ;;  %v81_v60 = vld [vmem:[%s1090_s0 + $0x40] sm:$0xff] }
  0x1c   :  { %v92_v59 = vpack.c.bf16 %v80_v58, %v79_v57  ;;  %v82_v61 = vld [vmem:[%s1090_s0 + $0x48] sm:$0xff]  ;;  %v784_v63 = vld [vmem:[#allocation8 + $0x38] sm:$0xff]  ;;  %v83_v1 = vld [vmem:[%s1090_s0 + $0x50] sm:$0xff] }
  0x1d   :  { %202 = vmatpush.bf16.msra.mxu0 %v668_v22  ;;  %v93_v62 = vpack.c.bf16 %v82_v61, %v81_v60  ;;  %v792_v0 = vld [vmem:[#allocation8 + $0x78] sm:$0xff]  ;;  %477 = vmatpush.bf16.msra.mxu2 %v784_v63  ;;  %v783_v4 = vld [vmem:[#allocation8 + $0x30] sm:$0xff]  ;;  %v782_v6 = vld [vmem:[#allocation8 + $0x28] sm:$0xff] }
  0x1e   :  { %251 = vmatpush.bf16.msra.mxu1 %v672_v23  ;;  %526 = vmatpush.bf16.msra.mxu3 %v792_v0  ;;  %v84_v2 = vld [vmem:[%s1090_s0 + $0x58] sm:$0xff]  ;;  %v790_v7 = vld [vmem:[#allocation8 + $0x68] sm:$0xff]  ;;  %v781_v8 = vld [vmem:[#allocation8 + $0x20] sm:$0xff] }
  0x1f   :  { %v94_v3 = vpack.c.bf16 %v84_v2, %v83_v1  ;;  %v791_v5 = vld [vmem:[#allocation8 + $0x70] sm:$0xff]  ;;  %v789_v9 = vld [vmem:[#allocation8 + $0x60] sm:$0xff]  ;;  %v780_v13 = vld [vmem:[#allocation8 + $0x18] sm:$0xff] }
  0x20   :  { %v85_v10 = vld [vmem:[%s1090_s0 + $0x60] sm:$0xff]  ;;  %v86_v11 = vld [vmem:[%s1090_s0 + $0x68] sm:$0xff]  ;;  %v779_v15 = vld [vmem:[#allocation8 + $0x10] sm:$0xff] }
  0x21   :  { %203 = vmatpush.bf16.msra.mxu0 %v660_v28  ;;  %478 = vmatpush.bf16.msra.mxu2 %v783_v4  ;;  %v95_v12 = vpack.c.bf16 %v86_v11, %v85_v10  ;;  %v788_v14 = vld [vmem:[#allocation8 + $0x58] sm:$0xff]  ;;  %v787_v16 = vld [vmem:[#allocation8 + $0x50] sm:$0xff]  ;;  %v778_v17 = vld [vmem:[#allocation8 + $0x8] sm:$0xff] }
  0x22   :  { %252 = vmatpush.bf16.msra.mxu1 %v664_v29  ;;  %527 = vmatpush.bf16.msra.mxu3 %v791_v5  ;;  %v786_v18 = vld [vmem:[#allocation8 + $0x48] sm:$0xff]  ;;  %v777_v19 = vld [vmem:[#allocation8] sm:$0xff]  ;;  %v88_v22 = vld [vmem:[%s1090_s0 + $0x78] sm:$0xff] }
  0x23   :  { %v785_v20 = vld [vmem:[#allocation8 + $0x40] sm:$0xff]  ;;  %v87_v21 = vld [vmem:[%s1090_s0 + $0x70] sm:$0xff]  ;;  %v113_v24 = vld [vmem:[#allocation6] sm:$0x3] }
  0x24   :  { %v96_v23 = vpack.c.bf16 %v88_v22, %v87_v21  ;;  %v1009_v27 = vperm.slane %v113_v24, 0  ;;  %v1011_v28 = vperm.slane %v113_v24, 1 }
  0x25   :  { %204 = vmatpush.bf16.msra.mxu0 %v652_v34  ;;  %479 = vmatpush.bf16.msra.mxu2 %v782_v6 }
  0x26   :  { %253 = vmatpush.bf16.msra.mxu1 %v656_v35  ;;  %528 = vmatpush.bf16.msra.mxu3 %v790_v7 }
  0x29   :  { %205 = vmatpush.bf16.msra.mxu0 %v644_v40  ;;  %480 = vmatpush.bf16.msra.mxu2 %v781_v8 }
  0x2a   :  { %254 = vmatpush.bf16.msra.mxu1 %v648_v41  ;;  %529 = vmatpush.bf16.msra.mxu3 %v789_v9 }
  0x2d   :  { %206 = vmatpush.bf16.msra.mxu0 %v636_v46  ;;  %481 = vmatpush.bf16.msra.mxu2 %v780_v13 }
  0x2e   :  { %255 = vmatpush.bf16.msra.mxu1 %v640_v49  ;;  %530 = vmatpush.bf16.msra.mxu3 %v788_v14 }
  0x30   :  { %207 = vmatmul.bf16.vlgmr.msra.gmra.mxu0 %v89_v50 }
  0x31   :  { %256 = vmatmul.bf16.vlgmr.msra.gmra.mxu1 %v89_v50  ;;  %482 = vmatpush.bf16.msra.mxu2 %v779_v15 }
  0x32   :  { %531 = vmatpush.bf16.msra.mxu3 %v787_v16 }
  0x35   :  { %483 = vmatpush.bf16.msra.mxu2 %v778_v17 }
  0x36   :  { %532 = vmatpush.bf16.msra.mxu3 %v786_v18 }
  0x39   :  { %484 = vmatpush.bf16.msra.mxu2 %v777_v19 }
  0x3a   :  { %533 = vmatpush.bf16.msra.mxu3 %v785_v20 }
  0x40   :  { %212 = vmatmul.bf16.gmra.mxu0 %v90_v53 }
  0x41   :  { %261 = vmatmul.bf16.gmra.mxu1 %v90_v53 }
  0x50   :  { %217 = vmatmul.bf16.gmra.mxu0 %v91_v56 }
  0x51   :  { %266 = vmatmul.bf16.gmra.mxu1 %v91_v56 }
  0x60   :  { %222 = vmatmul.bf16.gmra.mxu0 %v92_v59 }
  0x61   :  { %271 = vmatmul.bf16.gmra.mxu1 %v92_v59 }
  0x70   :  { %227 = vmatmul.bf16.gmra.mxu0 %v93_v62 }
  0x71   :  { %276 = vmatmul.bf16.gmra.mxu1 %v93_v62 }
  0x80   :  { %232 = vmatmul.bf16.gmra.mxu0 %v94_v3 }
  0x81   :  { %281 = vmatmul.bf16.gmra.mxu1 %v94_v3 }
  0x90   :  { %237 = vmatmul.bf16.gmra.mxu0 %v95_v12 }
  0x91   :  { %286 = vmatmul.bf16.gmra.mxu1 %v95_v12 }
  0xa0   :  { %242 = vmatmul.bf16.gmra.mxu0 %v96_v23 }
  0xa1   :  { %291 = vmatmul.bf16.gmra.mxu1 %v96_v23 }
  0xad   :  { %v208_v25 = vpop.f32.mrf.mxu0 }
  0xae   :  { %v257_v26 = vpop.f32.mrf.mxu1  ;;  %v209_v29 = vadd.f32 %v208_v25, %v1009_v27 }
  0xaf   :  { %v258_v30 = vadd.f32 %v257_v26, %v1011_v28 }
  0xb0   :  { %v297_v35 = vmax.f32 %v209_v29, 0.0 }
  0xb1   :  { %v298_v37 = vmax.f32 %v258_v30, 0.0 }
  0xb5   :  { %v210_v31 = vpop.f32.mrf.mxu0 }
  0xb6   :  { %v211_v32 = vadd.f32 %v210_v31, %v1009_v27  ;;  %v259_v33 = vpop.f32.mrf.mxu1 }
  0xb7   :  { %v260_v34 = vadd.f32 %v259_v33, %v1011_v28 }
  0xb8   :  { %v299_v36 = vmax.f32 %v211_v32, 0.0 }
  0xb9   :  { %v300_v38 = vmax.f32 %v260_v34, 0.0 }
  0xba   :  { %v329_v39 = vpack.c.bf16 %v299_v36, %v297_v35 }
  0xbb   :  { %v330_v40 = vpack.c.bf16 %v300_v38, %v298_v37 }
  0xbc   :  { %485 = vmatmul.bf16.vlgmr.msra.gmra.mxu2 %v329_v39 }
  0xbd   :  { %534 = vmatmul.bf16.vlgmr.msra.gmra.mxu3 %v330_v40  ;;  %v213_v41 = vpop.f32.mrf.mxu0 }
  0xbe   :  { %v262_v42 = vpop.f32.mrf.mxu1  ;;  %v214_v43 = vadd.f32 %v213_v41, %v1009_v27 }
  0xbf   :  { %v263_v44 = vadd.f32 %v262_v42, %v1011_v28 }
  0xc0   :  { %v301_v49 = vmax.f32 %v214_v43, 0.0 }
  0xc1   :  { %v302_v51 = vmax.f32 %v263_v44, 0.0 }
  0xc5   :  { %v215_v45 = vpop.f32.mrf.mxu0 }
  0xc6   :  { %v216_v46 = vadd.f32 %v215_v45, %v1009_v27  ;;  %v264_v47 = vpop.f32.mrf.mxu1 }
  0xc7   :  { %v265_v48 = vadd.f32 %v264_v47, %v1011_v28 }
  0xc8   :  { %v303_v50 = vmax.f32 %v216_v46, 0.0 }
  0xc9   :  { %v304_v52 = vmax.f32 %v265_v48, 0.0 }
  0xca   :  { %v331_v53 = vpack.c.bf16 %v303_v50, %v301_v49 }
  0xcb   :  { %v332_v54 = vpack.c.bf16 %v304_v52, %v302_v51 }
  0xcc   :  { %490 = vmatmul.bf16.gmra.mxu2 %v331_v53 }
  0xcd   :  { %539 = vmatmul.bf16.gmra.mxu3 %v332_v54  ;;  %v218_v55 = vpop.f32.mrf.mxu0 }
  0xce   :  { %v267_v56 = vpop.f32.mrf.mxu1  ;;  %v219_v57 = vadd.f32 %v218_v55, %v1009_v27 }
  0xcf   :  { %v268_v58 = vadd.f32 %v267_v56, %v1011_v28 }
  0xd0   :  { %v305_v63 = vmax.f32 %v219_v57, 0.0 }
  0xd1   :  { %v306_v1 = vmax.f32 %v268_v58, 0.0 }
  0xd5   :  { %v220_v59 = vpop.f32.mrf.mxu0 }
  0xd6   :  { %v221_v60 = vadd.f32 %v220_v59, %v1009_v27  ;;  %v269_v61 = vpop.f32.mrf.mxu1 }
  0xd7   :  { %v270_v62 = vadd.f32 %v269_v61, %v1011_v28 }
  0xd8   :  { %v307_v0 = vmax.f32 %v221_v60, 0.0 }
  0xd9   :  { %v308_v2 = vmax.f32 %v270_v62, 0.0 }
  0xda   :  { %v333_v3 = vpack.c.bf16 %v307_v0, %v305_v63 }
  0xdb   :  { %v334_v4 = vpack.c.bf16 %v308_v2, %v306_v1 }
  0xdc   :  { %495 = vmatmul.bf16.gmra.mxu2 %v333_v3 }
  0xdd   :  { %544 = vmatmul.bf16.gmra.mxu3 %v334_v4  ;;  %v223_v5 = vpop.f32.mrf.mxu0 }
  0xde   :  { %v272_v6 = vpop.f32.mrf.mxu1  ;;  %v224_v7 = vadd.f32 %v223_v5, %v1009_v27 }
  0xdf   :  { %v273_v8 = vadd.f32 %v272_v6, %v1011_v28 }
  0xe0   :  { %v309_v13 = vmax.f32 %v224_v7, 0.0 }
  0xe1   :  { %v310_v15 = vmax.f32 %v273_v8, 0.0 }
  0xe5   :  { %v225_v9 = vpop.f32.mrf.mxu0 }
  0xe6   :  { %v226_v10 = vadd.f32 %v225_v9, %v1009_v27  ;;  %v274_v11 = vpop.f32.mrf.mxu1 }
  0xe7   :  { %v275_v12 = vadd.f32 %v274_v11, %v1011_v28 }
  0xe8   :  { %v311_v14 = vmax.f32 %v226_v10, 0.0 }
  0xe9   :  { %v312_v16 = vmax.f32 %v275_v12, 0.0 }
  0xea   :  { %v335_v17 = vpack.c.bf16 %v311_v14, %v309_v13  ;;  %v1048_v13 = vld [vmem:[%s1094_s4] ss:$0 sm:$0xff] }
  0xeb   :  { %v336_v18 = vpack.c.bf16 %v312_v16, %v310_v15 }
  0xec   :  { %500 = vmatmul.bf16.gmra.mxu2 %v335_v17 }
  0xed   :  { %549 = vmatmul.bf16.gmra.mxu3 %v336_v18  ;;  %v228_v19 = vpop.f32.mrf.mxu0 }
  0xee   :  { %v277_v20 = vpop.f32.mrf.mxu1  ;;  %v229_v21 = vadd.f32 %v228_v19, %v1009_v27 }
  0xef   :  { %v278_v22 = vadd.f32 %v277_v20, %v1011_v28 }
  0xf0   :  { %v313_v29 = vmax.f32 %v229_v21, 0.0 }
  0xf1   :  { %v314_v31 = vmax.f32 %v278_v22, 0.0 }
  0xf5   :  { %v230_v23 = vpop.f32.mrf.mxu0 }
  0xf6   :  { %v231_v24 = vadd.f32 %v230_v23, %v1009_v27  ;;  %v279_v25 = vpop.f32.mrf.mxu1 }
  0xf7   :  { %v280_v26 = vadd.f32 %v279_v25, %v1011_v28 }
  0xf8   :  { %v315_v30 = vmax.f32 %v231_v24, 0.0 }
  0xf9   :  { %v316_v32 = vmax.f32 %v280_v26, 0.0 }
  0xfa   :  { %v337_v33 = vpack.c.bf16 %v315_v30, %v313_v29 }
  0xfb   :  { %v338_v34 = vpack.c.bf16 %v316_v32, %v314_v31 }
  0xfc   :  { %505 = vmatmul.bf16.gmra.mxu2 %v337_v33 }
  0xfd   :  { %554 = vmatmul.bf16.gmra.mxu3 %v338_v34  ;;  %v233_v35 = vpop.f32.mrf.mxu0 }
  0xfe   :  { %v282_v36 = vpop.f32.mrf.mxu1  ;;  %v234_v37 = vadd.f32 %v233_v35, %v1009_v27 }
  0xff   :  { %v283_v38 = vadd.f32 %v282_v36, %v1011_v28 }
 0x100   :  { %v317_v43 = vmax.f32 %v234_v37, 0.0 }
 0x101   :  { %v318_v45 = vmax.f32 %v283_v38, 0.0 }
 0x105   :  { %v235_v39 = vpop.f32.mrf.mxu0 }
 0x106   :  { %v236_v40 = vadd.f32 %v235_v39, %v1009_v27  ;;  %v284_v41 = vpop.f32.mrf.mxu1 }
 0x107   :  { %v285_v42 = vadd.f32 %v284_v41, %v1011_v28 }
 0x108   :  { %v319_v44 = vmax.f32 %v236_v40, 0.0 }
 0x109   :  { %v320_v46 = vmax.f32 %v285_v42, 0.0 }
 0x10a   :  { %v339_v47 = vpack.c.bf16 %v319_v44, %v317_v43 }
 0x10b   :  { %v340_v48 = vpack.c.bf16 %v320_v46, %v318_v45 }
 0x10c   :  { %510 = vmatmul.bf16.gmra.mxu2 %v339_v47 }
 0x10d   :  { %559 = vmatmul.bf16.gmra.mxu3 %v340_v48  ;;  %v238_v49 = vpop.f32.mrf.mxu0 }
 0x10e   :  { %v287_v50 = vpop.f32.mrf.mxu1  ;;  %v239_v51 = vadd.f32 %v238_v49, %v1009_v27 }
 0x10f   :  { %v288_v52 = vadd.f32 %v287_v50, %v1011_v28 }
 0x110   :  { %v321_v57 = vmax.f32 %v239_v51, 0.0 }
 0x111   :  { %v322_v59 = vmax.f32 %v288_v52, 0.0 }
 0x115   :  { %v240_v53 = vpop.f32.mrf.mxu0 }
 0x116   :  { %v241_v54 = vadd.f32 %v240_v53, %v1009_v27  ;;  %v289_v55 = vpop.f32.mrf.mxu1 }
 0x117   :  { %v290_v56 = vadd.f32 %v289_v55, %v1011_v28 }
 0x118   :  { %v323_v58 = vmax.f32 %v241_v54, 0.0 }
 0x119   :  { %v324_v60 = vmax.f32 %v290_v56, 0.0 }
 0x11a   :  { %v341_v61 = vpack.c.bf16 %v323_v58, %v321_v57 }
 0x11b   :  { %v342_v62 = vpack.c.bf16 %v324_v60, %v322_v59 }
 0x11c   :  { %515 = vmatmul.bf16.gmra.mxu2 %v341_v61 }
 0x11d   :  { %564 = vmatmul.bf16.gmra.mxu3 %v342_v62  ;;  %v243_v63 = vpop.f32.mrf.mxu0 }
 0x11e   :  { %v292_v0 = vpop.f32.mrf.mxu1  ;;  %v244_v1 = vadd.f32 %v243_v63, %v1009_v27 }
 0x11f   :  { %v293_v2 = vadd.f32 %v292_v0, %v1011_v28 }
 0x120   :  { %v325_v7 = vmax.f32 %v244_v1, 0.0 }
 0x121   :  { %v326_v9 = vmax.f32 %v293_v2, 0.0 }
 0x125   :  { %v245_v3 = vpop.f32.mrf.mxu0 }
 0x126   :  { %v246_v4 = vadd.f32 %v245_v3, %v1009_v27  ;;  %v294_v5 = vpop.f32.mrf.mxu1 }
 0x127   :  { %v295_v6 = vadd.f32 %v294_v5, %v1011_v28 }
 0x128   :  { %v327_v8 = vmax.f32 %v246_v4, 0.0 }
 0x129   :  { %v328_v10 = vmax.f32 %v295_v6, 0.0 }
 0x12a   :  { %v343_v11 = vpack.c.bf16 %v327_v8, %v325_v7 }
 0x12b   :  { %v344_v12 = vpack.c.bf16 %v328_v10, %v326_v9 }
 0x12c   :  { %520 = vmatmul.bf16.gmra.mxu2 %v343_v11 }
 0x12d   :  { %569 = vmatmul.bf16.gmra.mxu3 %v344_v12 }
 0x13f   :  { %v486_v14 = vpop.f32.mrf.mxu2 }
 0x140   :  { %v487_v15 = vadd.f32 %v1048_v13, %v486_v14  ;;  %v535_v27 = vpop.f32.mrf.mxu3 }
 0x142   :  { %v1051_v16 = vadd.f32 %v535_v27, %v487_v15 }
 0x147   :  { %v488_v28 = vpop.f32.mrf.mxu2 }
 0x148   :  { %v489_v17 = vadd.f32 %v1048_v13, %v488_v28  ;;  %v537_v18 = vpop.f32.mrf.mxu3 }
 0x14a   :  { %v1054_v19 = vadd.f32 %v537_v18, %v489_v17 }
 0x14f   :  { %v491_v20 = vpop.f32.mrf.mxu2 }
 0x150   :  { %v492_v21 = vadd.f32 %v1048_v13, %v491_v20  ;;  %v540_v22 = vpop.f32.mrf.mxu3 }
 0x152   :  { %v1057_v23 = vadd.f32 %v540_v22, %v492_v21 }
 0x157   :  { %v493_v24 = vpop.f32.mrf.mxu2 }
 0x158   :  { %v494_v25 = vadd.f32 %v1048_v13, %v493_v24  ;;  %v542_v26 = vpop.f32.mrf.mxu3 }
 0x15a   :  { %v1060_v29 = vadd.f32 %v542_v26, %v494_v25 }
 0x15f   :  { %v496_v30 = vpop.f32.mrf.mxu2 }
 0x160   :  { %v497_v31 = vadd.f32 %v1048_v13, %v496_v30  ;;  %v545_v32 = vpop.f32.mrf.mxu3  ;;  %v578_v30 = vmax.f32 %v1060_v29, 0.0 }
 0x162   :  { %v1063_v33 = vadd.f32 %v545_v32, %v497_v31  ;;  %v577_v31 = vmax.f32 %v1057_v23, 0.0  ;;  %v576_v32 = vmax.f32 %v1054_v19, 0.0 }
 0x167   :  { %v498_v34 = vpop.f32.mrf.mxu2 }
 0x168   :  { %v499_v35 = vadd.f32 %v1048_v13, %v498_v34  ;;  %v547_v36 = vpop.f32.mrf.mxu3  ;;  %v575_v34 = vmax.f32 %v1051_v16, 0.0 }
 0x16a   :  { %v548_v37 = vadd.f32 %v547_v36, %v499_v35  ;;  %v591_v35 = vld [vmem:[%s1095_s5] sm:$0x1] }
 0x16c   :  { %v580_v26 = vmax.f32 %v548_v37, 0.0 }
 0x16f   :  { %v501_v38 = vpop.f32.mrf.mxu2 }
 0x170   :  { %v502_v39 = vadd.f32 %v1048_v13, %v501_v38  ;;  %v550_v40 = vpop.f32.mrf.mxu3 }
 0x172   :  { %v551_v41 = vadd.f32 %v550_v40, %v502_v39 }
 0x174   :  { %v581_v25 = vmax.f32 %v551_v41, 0.0 }
 0x177   :  { %v503_v42 = vpop.f32.mrf.mxu2 }
 0x178   :  { %v504_v43 = vadd.f32 %v1048_v13, %v503_v42  ;;  %v552_v44 = vpop.f32.mrf.mxu3 }
 0x17a   :  { %v553_v45 = vadd.f32 %v552_v44, %v504_v43 }
 0x17c   :  { %v582_v24 = vmax.f32 %v553_v45, 0.0 }
 0x17f   :  { %v506_v46 = vpop.f32.mrf.mxu2 }
 0x180   :  { %v507_v47 = vadd.f32 %v1048_v13, %v506_v46  ;;  %v555_v48 = vpop.f32.mrf.mxu3 }
 0x182   :  { %v556_v49 = vadd.f32 %v555_v48, %v507_v47 }
 0x184   :  { %v583_v22 = vmax.f32 %v556_v49, 0.0 }
 0x187   :  { %v508_v50 = vpop.f32.mrf.mxu2 }
 0x188   :  { %v509_v51 = vadd.f32 %v1048_v13, %v508_v50  ;;  %v557_v52 = vpop.f32.mrf.mxu3 }
 0x18a   :  { %v558_v53 = vadd.f32 %v557_v52, %v509_v51 }
 0x18c   :  { %v584_v21 = vmax.f32 %v558_v53, 0.0 }
 0x18f   :  { %v511_v54 = vpop.f32.mrf.mxu2 }
 0x190   :  { %v560_v55 = vpop.f32.mrf.mxu3  ;;  %v512_v15 = vadd.f32 %v1048_v13, %v511_v54 }
 0x192   :  { %v561_v17 = vadd.f32 %v560_v55, %v512_v15 }
 0x194   :  { %v585_v20 = vmax.f32 %v561_v17, 0.0 }
 0x197   :  { %v513_v56 = vpop.f32.mrf.mxu2 }
 0x198   :  { %v562_v57 = vpop.f32.mrf.mxu3  ;;  %v514_v11 = vadd.f32 %v1048_v13, %v513_v56 }
 0x19a   :  { %v563_v27 = vadd.f32 %v562_v57, %v514_v11 }
 0x19c   :  { %v586_v18 = vmax.f32 %v563_v27, 0.0 }
 0x19f   :  { %v516_v58 = vpop.f32.mrf.mxu2 }
 0x1a0   :  { %v565_v59 = vpop.f32.mrf.mxu3  ;;  %v517_v8 = vadd.f32 %v1048_v13, %v516_v58 }
 0x1a2   :  { %v566_v12 = vadd.f32 %v565_v59, %v517_v8 }
 0x1a4   :  { %v587_v28 = vmax.f32 %v566_v12, 0.0 }
 0x1a7   :  { %v518_v60 = vpop.f32.mrf.mxu2 }
 0x1a8   :  { %v567_v61 = vpop.f32.mrf.mxu3  ;;  %v519_v5 = vadd.f32 %v1048_v13, %v518_v60 }
 0x1aa   :  { %v568_v9 = vadd.f32 %v567_v61, %v519_v5 }
 0x1ac   :  { %v588_v14 = vmax.f32 %v568_v9, 0.0 }
 0x1af   :  { %v521_v62 = vpop.f32.mrf.mxu2 }
 0x1b0   :  { %v570_v63 = vpop.f32.mrf.mxu3  ;;  %v522_v1 = vadd.f32 %v1048_v13, %v521_v62 }
 0x1b2   :  { %v571_v6 = vadd.f32 %v570_v63, %v522_v1 }
 0x1b4   :  { %v589_v10 = vmax.f32 %v571_v6, 0.0 }
 0x1b7   :  { %v523_v0 = vpop.f32.mrf.mxu2 }
 0x1b8   :  { %v524_v2 = vadd.f32 %v1048_v13, %v523_v0  ;;  %v572_v3 = vpop.f32.mrf.mxu3  ;;  %v579_v13 = vmax.f32 %v1063_v33, 0.0  ;;  %v593_v33 = vstv %s1096_s6 }
 0x1ba   :  { %v573_v4 = vadd.f32 %v572_v3, %v524_v2 }
 0x1bc   :  { %v590_v7 = vmax.f32 %v573_v4, 0.0 }
 0x1be   :  { %594 = vmatpush.xpose.msrb.mxu0 %v590_v7 }
 0x1c2   :  { %595 = vmatpush.xpose.msrb.mxu0 %v589_v10 }
 0x1c6   :  { %596 = vmatpush.xpose.msrb.mxu0 %v588_v14 }
 0x1ca   :  { %597 = vmatpush.xpose.msrb.mxu0 %v587_v28 }
 0x1ce   :  { %598 = vmatpush.xpose.msrb.mxu0 %v586_v18 }
 0x1d2   :  { %599 = vmatpush.xpose.msrb.mxu0 %v585_v20 }
 0x1d6   :  { %600 = vmatpush.xpose.msrb.mxu0 %v584_v21 }
 0x1da   :  { %601 = vmatpush.xpose.msrb.mxu0 %v583_v22 }
 0x1de   :  { %602 = vmatpush.xpose.msrb.mxu0 %v582_v24 }
 0x1e2   :  { %603 = vmatpush.xpose.msrb.mxu0 %v581_v25 }
 0x1e6   :  { %604 = vmatpush.xpose.msrb.mxu0 %v580_v26 }
 0x1ea   :  { %605 = vmatpush.xpose.msrb.mxu0 %v579_v13 }
 0x1ee   :  { %606 = vmatpush.xpose.msrb.mxu0 %v578_v30 }
 0x1f2   :  { %607 = vmatpush.xpose.msrb.mxu0 %v577_v31 }
 0x1f6   :  { %608 = vmatpush.xpose.msrb.mxu0 %v576_v32 }
 0x1fa   :  { %609 = vmatpush.xpose.msrb.mxu0 %v575_v34 }
 0x1fd   :  { %610 = vmatmul.f32.vlgmr.msrb.gmra.mxu0 %v591_v35 }
 0x27a   :  { %v611_v19 = vpop.f32.mrf.mxu0 }
 0x27b   :  { %v612_v23 = vadd.f32 %v611_v19, %v593_v33 }
 0x27d   :  { %614 = vst [vmem:[#allocation9] sm:$0x1] %v612_v23 }
 0x27e   :  { %625 = dma.vmem_to_hbm [thread:$0]  %s621_s28, 16, %s623_s8, [#allocation5]  }
 0x27f   :  { %902 = dma.done.wait [#allocation5], 16  }
 0x280   :  { %903 = vsyncadd [#allocation5], 4294967280 }
 0x281   :  { %630 = vsyncpa [#allocation4], 1 }
 0x282   :  { %631 = vsyncpa [#allocation7], 1 }
 0x283   :  { %632 = vsyncpa [#allocation5], 1 }

</bundles_post_ra>
